<compile_context>
chip_gen: v7x
topology: tpu7x:2x2x1
jax: 0.10.0
libtpu: 0.0.40
codegen_flags: <defaults>
</compile_context>

<pallas_src>
import math

import jax
import jax.numpy as jnp
from jax.experimental import pallas as pl
from jax.experimental.pallas import tpu as pltpu

_MIB = 1 << 20


def _round_up(x, m):
    return (x + m - 1) // m * m


def _gelu_erf(x):
    # exact gelu (matches the PyTorch module): x * 0.5 * (1 + erf(x / sqrt(2)))
    return x * 0.5 * (1.0 + jax.lax.erf(x / math.sqrt(2.0)))


def ffn_kernel(x_ref, w1_ref, b1_ref, w2_ref, b2_ref, o_ref, acc_ref):
    # Grid = (row_tiles, ff_tiles).  Axis 1 is a reduction over d_ff chunks.
    # x_ref : (tm, d_model_p)    compute dtype (bf16 by default)
    # w1_ref: (d_model_p, tff)   compute dtype
    # b1_ref: (1, tff)           f32
    # w2_ref: (tff, d_model_p)   compute dtype
    # b2_ref: (1, d_model_p)     f32
    # o_ref : (tm, d_model_p)    output dtype
    # acc_ref: (tm, d_model_p)   f32 accumulator scratch
    k = pl.program_id(1)

    @pl.when(k == 0)
    def _init():
        acc_ref[...] = jnp.zeros_like(acc_ref)

    # fc1 (partial over this d_ff chunk), bias + exact GELU in f32.
    h = jnp.dot(x_ref[...], w1_ref[...], preferred_element_type=jnp.float32)
    h = _gelu_erf(h + b1_ref[...])

    # fc2 partial-sum: accumulate into the f32 scratch.
    acc_ref[...] += jnp.dot(h.astype(w2_ref.dtype), w2_ref[...],
                            preferred_element_type=jnp.float32)

    @pl.when(k == pl.num_programs(1) - 1)
    def _finalize():
        o_ref[...] = (acc_ref[...] + b2_ref[...]).astype(o_ref.dtype)


def _vmem_estimate(tm, d_model_p, tff, c_size, o_size):
    """Conservative VMEM working-set estimate (assumes double-buffering)."""
    x_buf = 2 * tm * d_model_p * c_size
    o_buf = 2 * tm * d_model_p * o_size
    acc = tm * d_model_p * 4
    w_buf = 2 * 2 * d_model_p * tff * c_size            # W1 + W2 tiles
    b_buf = 2 * 8 * (tff + d_model_p) * 4               # padded bias tiles
    h_tmp = tm * tff * (4 + c_size)                     # f32 h + bf16 copy
    return x_buf + o_buf + acc + w_buf + b_buf + h_tmp


def _choose_tff(d_ff_p, d_model_p, tm, c_size, o_size, budget):
    """Largest d_ff tile (multiple of 128, dividing d_ff_p) fitting the budget."""
    m = d_ff_p // 128
    for k in sorted((k for k in range(1, m + 1) if m % k == 0), reverse=True):
        tff = 128 * k
        if _vmem_estimate(tm, d_model_p, tff, c_size, o_size) <= budget:
            return tff
    return 128


def poswise_ffn(x, w1, b1, w2, b2, *, tm=256, compute_dtype=jnp.bfloat16,
                vmem_budget_bytes=44 * _MIB):
    """x: [batch, seq, d_model] -> [batch, seq, d_model].

    Weights are stored as [in, out] (transpose of nn.Linear.weight).
    """
    batch, seq, d_model = x.shape
    d_ff = w1.shape[1]
    assert w1.shape == (d_model, d_ff)
    assert w2.shape == (d_ff, d_model)
    M = batch * seq
    out_dtype = x.dtype

    # Lane-dense padding of the feature dims, row padding up to the row tile.
    d_model_p = _round_up(d_model, 128)
    d_ff_p = _round_up(d_ff, 128)
    # Large row tiles feed the MXU; clamp for tiny inputs.  (For v7x megacore,
    # prefer tm such that M // tm >= 2 so both TensorCores get work.)
    tm_eff = max(8, min(_round_up(tm, 8), _round_up(M, 8)))
    M_p = _round_up(M, tm_eff)

    c_size = jnp.dtype(compute_dtype).itemsize
    o_size = jnp.dtype(out_dtype).itemsize
    tff = _choose_tff(d_ff_p, d_model_p, tm_eff, c_size, o_size, vmem_budget_bytes)
    n_ff = d_ff_p // tff
    n_row = M_p // tm_eff
    weights_resident = (n_ff == 1)

    # Zero padding keeps results exact: padded x/W columns contribute 0, and
    # gelu(0)=0 so padded d_ff rows of W2 also contribute 0.
    x2 = jnp.pad(x.reshape(M, d_model),
                 ((0, M_p - M), (0, d_model_p - d_model))).astype(compute_dtype)
    w1p = jnp.pad(w1, ((0, d_model_p - d_model), (0, d_ff_p - d_ff))).astype(compute_dtype)
    w2p = jnp.pad(w2, ((0, d_ff_p - d_ff), (0, d_model_p - d_model))).astype(compute_dtype)
    b1p = jnp.pad(b1, (0, d_ff_p - d_ff)).astype(jnp.float32).reshape(1, d_ff_p)
    b2p = jnp.pad(b2, (0, d_model_p - d_model)).astype(jnp.float32).reshape(1, d_model_p)

    vmem_need = _vmem_estimate(tm_eff, d_model_p, tff, c_size, o_size)
    vmem_limit = int(min(max(int(vmem_need * 1.25) + 2 * _MIB, 32 * _MIB),
                         64 * _MIB))

    w_reads = 1 if weights_resident else n_row
    cost = pl.CostEstimate(
        flops=int(4 * M_p * d_model_p * d_ff_p),          # two matmuls
        transcendentals=int(M_p * d_ff_p),                # one erf per h element
        bytes_accessed=int(M_p * d_model_p * (c_size + o_size)
                           + w_reads * 2 * d_model_p * d_ff_p * c_size
                           + w_reads * (d_ff_p + d_model_p) * 4),
    )

    def _specs(single_buffer):
        def kw(is_const):
            # Constant-index blocks never re-fetch; single-buffer to save VMEM.
            return {"pipeline_mode": pl.Buffered(1)} if (single_buffer and is_const) else {}
        in_specs = [
            pl.BlockSpec((tm_eff, d_model_p), lambda i, k: (i, 0)),                      # x rows
            pl.BlockSpec((d_model_p, tff), lambda i, k: (0, k), **kw(weights_resident)),  # W1
            pl.BlockSpec((1, tff), lambda i, k: (0, k), **kw(weights_resident)),          # b1
            pl.BlockSpec((tff, d_model_p), lambda i, k: (k, 0), **kw(weights_resident)),  # W2
            pl.BlockSpec((1, d_model_p), lambda i, k: (0, 0), **kw(True)),                # b2
        ]
        out_spec = pl.BlockSpec((tm_eff, d_model_p), lambda i, k: (i, 0))
        return in_specs, out_spec

    def _run(single_buffer):
        in_specs, out_spec = _specs(single_buffer)
        return pl.pallas_call(
            ffn_kernel,
            out_shape=jax.ShapeDtypeStruct((M_p, d_model_p), out_dtype),
            grid_spec=pltpu.PrefetchScalarGridSpec(
                num_scalar_prefetch=0,
                grid=(n_row, n_ff),
                in_specs=in_specs,
                out_specs=out_spec,
                scratch_shapes=[pltpu.VMEM((tm_eff, d_model_p), jnp.float32)],
            ),
            compiler_params=pltpu.CompilerParams(
                dimension_semantics=("parallel", "arbitrary"),
                vmem_limit_bytes=vmem_limit,
            ),
            cost_estimate=cost,
        )(x2, w1p, b1p, w2p, b2p)

    try:
        out2 = _run(True)
    except Exception:
        # Fallback if pipeline_mode=pl.Buffered(1) is unsupported here; the
        # VMEM budget already assumed double-buffering so this still fits.
        out2 = _run(False)

    return out2[:M, :d_model].reshape(batch, seq, d_model)


def init_params(key, d_model, dtype=jnp.float32):
    """Deterministic nn.Linear-style init (uniform +/- 1/sqrt(fan_in))."""
    d_ff = 4 * d_model
    k1, k2, k3, k4 = jax.random.split(key, 4)
    lim1 = 1.0 / math.sqrt(d_model)
    lim2 = 1.0 / math.sqrt(d_ff)
    w1 = jax.random.uniform(k1, (d_model, d_ff), dtype, -lim1, lim1)   # fc1.weight.T
    b1 = jax.random.uniform(k2, (d_ff,), dtype, -lim1, lim1)
    w2 = jax.random.uniform(k3, (d_ff, d_model), dtype, -lim2, lim2)   # fc2.weight.T
    b2 = jax.random.uniform(k4, (d_model,), dtype, -lim2, lim2)
    return w1, b1, w2, b2


def reference_ffn(x, w1, b1, w2, b2):
    h = jnp.dot(x, w1) + b1
    h = _gelu_erf(h)
    return jnp.dot(h, w2) + b2


if __name__ == "__main__":
    key = jax.random.PRNGKey(0)
    batch, seq, d_model = 2, 8, 32   # small shapes; d_ff = 128

    kx, kp = jax.random.split(key)
    x = jax.random.normal(kx, (batch, seq, d_model), jnp.float32)
    w1, b1, w2, b2 = init_params(kp, d_model)

    ref = reference_ffn(x, w1, b1, w2, b2)

    # f32 compute path: tight check of kernel plumbing / padding / reduction.
    out_f32 = jax.block_until_ready(
        poswise_ffn(x, w1, b1, w2, b2, compute_dtype=jnp.float32))
    assert out_f32.shape == (batch, seq, d_model)
    assert jnp.allclose(out_f32, ref, atol=1e-5, rtol=1e-5), "f32 mismatch vs reference"

    # Default bf16 MXU path: looser tolerance for the reduced input precision.
    out_bf16 = jax.block_until_ready(poswise_ffn(x, w1, b1, w2, b2))
    assert out_bf16.shape == (batch, seq, d_model)
    assert jnp.allclose(out_bf16, ref, atol=5e-2, rtol=5e-2), "bf16 mismatch vs reference"

    print("KERNEL_OK")
</pallas_src>

<mosaic_0001>
module attributes {stable_mosaic.version = 11 : i64} {
  func.func @ffn_kernel(%arg0: i32, %arg1: i32, %arg2: memref<16x128xf32, #tpu.memory_space<vmem>>, %arg3: memref<128x128xf32, #tpu.memory_space<vmem>>, %arg4: memref<1x128xf32, #tpu.memory_space<vmem>>, %arg5: memref<128x128xf32, #tpu.memory_space<vmem>>, %arg6: memref<1x128xf32, #tpu.memory_space<vmem>>, %arg7: memref<16x128xf32, #tpu.memory_space<vmem>>, %arg8: memref<16x128xf32, #tpu.memory_space<vmem>>) attributes {dimension_semantics = [#tpu.dimension_semantics<parallel>, #tpu.dimension_semantics<arbitrary>], iteration_bounds = array<i64: 1, 1>, scalar_prefetch = 0 : i64, scratch_operands = 1 : i64, tpu.core_type = #tpu.core_type<tc>, window_params = [{transform_indices = @transform_0, window_bounds = array<i64: 16, 128>}, {pipeline_mode = #tpu.pipeline_mode<synchronous>, transform_indices = @transform_1, window_bounds = array<i64: 128, 128>}, {pipeline_mode = #tpu.pipeline_mode<synchronous>, transform_indices = @transform_2, window_bounds = array<i64: 1, 128>}, {pipeline_mode = #tpu.pipeline_mode<synchronous>, transform_indices = @transform_3, window_bounds = array<i64: 128, 128>}, {pipeline_mode = #tpu.pipeline_mode<synchronous>, transform_indices = @transform_4, window_bounds = array<i64: 1, 128>}, {transform_indices = @transform_5, window_bounds = array<i64: 16, 128>}]} {
    %c0_i32 = arith.constant 0 : i32
    %0 = arith.cmpi eq, %arg1, %c0_i32 : i32
    %1 = arith.extui %0 : i1 to i32
    %c0_i32_0 = arith.constant 0 : i32
    %2 = arith.cmpi ne, %1, %c0_i32_0 : i32
    scf.if %2 {
      %cst_18 = arith.constant 0.000000e+00 : f32
      %25 = vector.broadcast %cst_18 : f32 to vector<16x128xf32>
      %c0_19 = arith.constant 0 : index
      %c0_20 = arith.constant 0 : index
      %26 = vector.load %arg8[%c0_19, %c0_20] : memref<16x128xf32, #tpu.memory_space<vmem>>, vector<16x128xf32>
      tpu.vector_store %arg8[%c0_19, %c0_20], %25 {strides = array<i32>} : memref<16x128xf32, #tpu.memory_space<vmem>>, vector<16x128xf32>,
    } else {
    }
    %c0 = arith.constant 0 : index
    %c0_1 = arith.constant 0 : index
    %3 = vector.load %arg2[%c0, %c0_1] : memref<16x128xf32, #tpu.memory_space<vmem>>, vector<16x128xf32>
    %c0_2 = arith.constant 0 : index
    %c0_3 = arith.constant 0 : index
    %4 = vector.load %arg3[%c0_2, %c0_3] : memref<128x128xf32, #tpu.memory_space<vmem>>, vector<128x128xf32>
    %cst = arith.constant dense<0.000000e+00> : vector<16x128xf32>
    %5 = tpu.matmul %3, %4, %cst {dimension_numbers = #tpu.dot_dimension_numbers<[1], [0], [0], [1], [0, 0, 1, 1], [], []>} : vector<16x128xf32>, vector<128x128xf32>, vector<16x128xf32> -> vector<16x128xf32>
    %c0_4 = arith.constant 0 : index
    %c0_5 = arith.constant 0 : index
    %6 = vector.load %arg4[%c0_4, %c0_5] : memref<1x128xf32, #tpu.memory_space<vmem>>, vector<1x128xf32>
    %7 = vector.broadcast %6 : vector<1x128xf32> to vector<16x128xf32>
    %8 = arith.addf %5, %7 : vector<16x128xf32>
    %cst_6 = arith.constant 5.000000e-01 : f32
    %9 = vector.broadcast %cst_6 : f32 to vector<16x128xf32>
    %10 = arith.mulf %8, %9 : vector<16x128xf32>
    %cst_7 = arith.constant 1.41421354 : f32
    %11 = vector.broadcast %cst_7 : f32 to vector<16x128xf32>
    %12 = arith.divf %8, %11 : vector<16x128xf32>
    %13 = math.erf %12 : vector<16x128xf32>
    %cst_8 = arith.constant 1.000000e+00 : f32
    %14 = vector.broadcast %cst_8 : f32 to vector<16x128xf32>
    %15 = arith.addf %14, %13 : vector<16x128xf32>
    %16 = arith.mulf %10, %15 : vector<16x128xf32>
    %c0_9 = arith.constant 0 : index
    %c0_10 = arith.constant 0 : index
    %17 = vector.load %arg8[%c0_9, %c0_10] : memref<16x128xf32, #tpu.memory_space<vmem>>, vector<16x128xf32>
    %c0_11 = arith.constant 0 : index
    %c0_12 = arith.constant 0 : index
    %18 = vector.load %arg5[%c0_11, %c0_12] : memref<128x128xf32, #tpu.memory_space<vmem>>, vector<128x128xf32>
    %cst_13 = arith.constant dense<0.000000e+00> : vector<16x128xf32>
    %19 = tpu.matmul %16, %18, %cst_13 {dimension_numbers = #tpu.dot_dimension_numbers<[1], [0], [0], [1], [0, 0, 1, 1], [], []>} : vector<16x128xf32>, vector<128x128xf32>, vector<16x128xf32> -> vector<16x128xf32>
    %20 = arith.addf %17, %19 : vector<16x128xf32>
    %c0_14 = arith.constant 0 : index
    %c0_15 = arith.constant 0 : index
    %21 = vector.load %arg8[%c0_14, %c0_15] : memref<16x128xf32, #tpu.memory_space<vmem>>, vector<16x128xf32>
    tpu.vector_store %arg8[%c0_14, %c0_15], %20 {strides = array<i32>} : memref<16x128xf32, #tpu.memory_space<vmem>>, vector<16x128xf32>,
    %c0_i32_16 = arith.constant 0 : i32
    %22 = arith.cmpi eq, %arg1, %c0_i32_16 : i32
    %23 = arith.extui %22 : i1 to i32
    %c0_i32_17 = arith.constant 0 : i32
    %24 = arith.cmpi ne, %23, %c0_i32_17 : i32
    scf.if %24 {
      %c0_18 = arith.constant 0 : index
      %c0_19 = arith.constant 0 : index
      %25 = vector.load %arg8[%c0_18, %c0_19] : memref<16x128xf32, #tpu.memory_space<vmem>>, vector<16x128xf32>
      %c0_20 = arith.constant 0 : index
      %c0_21 = arith.constant 0 : index
      %26 = vector.load %arg6[%c0_20, %c0_21] : memref<1x128xf32, #tpu.memory_space<vmem>>, vector<1x128xf32>
      %27 = vector.broadcast %26 : vector<1x128xf32> to vector<16x128xf32>
      %28 = arith.addf %25, %27 : vector<16x128xf32>
      %c0_22 = arith.constant 0 : index
      %c0_23 = arith.constant 0 : index
      %29 = vector.load %arg7[%c0_22, %c0_23] : memref<16x128xf32, #tpu.memory_space<vmem>>, vector<16x128xf32>
      tpu.vector_store %arg7[%c0_22, %c0_23], %28 {strides = array<i32>} : memref<16x128xf32, #tpu.memory_space<vmem>>, vector<16x128xf32>,
    } else {
    }
    return
  }
  func.func @transform_0(%arg0: i32, %arg1: i32) -> (i32, i32) {
    %c0_i32 = arith.constant 0 : i32
    %c0_i32_0 = arith.constant 0 : i32
    return %arg0, %c0_i32 : i32, i32
  }
  func.func @transform_1(%arg0: i32, %arg1: i32) -> (i32, i32) {
    %c0_i32 = arith.constant 0 : i32
    %c0_i32_0 = arith.constant 0 : i32
    return %c0_i32, %arg1 : i32, i32
  }
  func.func @transform_2(%arg0: i32, %arg1: i32) -> (i32, i32) {
    %c0_i32 = arith.constant 0 : i32
    %c0_i32_0 = arith.constant 0 : i32
    return %c0_i32, %arg1 : i32, i32
  }
  func.func @transform_3(%arg0: i32, %arg1: i32) -> (i32, i32) {
    %c0_i32 = arith.constant 0 : i32
    %c0_i32_0 = arith.constant 0 : i32
    return %arg1, %c0_i32 : i32, i32
  }
  func.func @transform_4(%arg0: i32, %arg1: i32) -> (i32, i32) {
    %c0_i32 = arith.constant 0 : i32
    %c0_i32_0 = arith.constant 0 : i32
    %c0_i32_1 = arith.constant 0 : i32
    return %c0_i32, %c0_i32_0 : i32, i32
  }
  func.func @transform_5(%arg0: i32, %arg1: i32) -> (i32, i32) {
    %c0_i32 = arith.constant 0 : i32
    %c0_i32_0 = arith.constant 0 : i32
    return %arg0, %c0_i32 : i32, i32
  }
}

module attributes {stable_mosaic.version = 11 : i64} {
  func.func @ffn_kernel(%arg0: i32, %arg1: i32, %arg2: memref<16x128xf32, #tpu.memory_space<vmem>>, %arg3: memref<128x128xf32, #tpu.memory_space<vmem>>, %arg4: memref<1x128xf32, #tpu.memory_space<vmem>>, %arg5: memref<128x128xf32, #tpu.memory_space<vmem>>, %arg6: memref<1x128xf32, #tpu.memory_space<vmem>>, %arg7: memref<16x128xf32, #tpu.memory_space<vmem>>, %arg8: memref<16x128xf32, #tpu.memory_space<vmem>>) attributes {dimension_semantics = [#tpu.dimension_semantics<parallel>, #tpu.dimension_semantics<arbitrary>], iteration_bounds = array<i64: 1, 1>, scalar_prefetch = 0 : i64, scratch_operands = 1 : i64, tpu.core_type = #tpu.core_type<tc>, window_params = [{transform_indices = @transform_0, window_bounds = array<i64: 16, 128>}, {transform_indices = @transform_1, window_bounds = array<i64: 128, 128>}, {transform_indices = @transform_2, window_bounds = array<i64: 1, 128>}, {transform_indices = @transform_3, window_bounds = array<i64: 128, 128>}, {pipeline_mode = #tpu.pipeline_mode<synchronous>, transform_indices = @transform_4, window_bounds = array<i64: 1, 128>}, {transform_indices = @transform_5, window_bounds = array<i64: 16, 128>}]} {
    %c0_i32 = arith.constant 0 : i32
    %0 = arith.cmpi eq, %arg1, %c0_i32 : i32
    %1 = arith.extui %0 : i1 to i32
    %c0_i32_0 = arith.constant 0 : i32
    %2 = arith.cmpi ne, %1, %c0_i32_0 : i32
    scf.if %2 {
      %cst_18 = arith.constant 0.000000e+00 : f32
      %25 = vector.broadcast %cst_18 : f32 to vector<16x128xf32>
      %c0_19 = arith.constant 0 : index
      %c0_20 = arith.constant 0 : index
      %26 = vector.load %arg8[%c0_19, %c0_20] : memref<16x128xf32, #tpu.memory_space<vmem>>, vector<16x128xf32>
      tpu.vector_store %arg8[%c0_19, %c0_20], %25 {strides = array<i32>} : memref<16x128xf32, #tpu.memory_space<vmem>>, vector<16x128xf32>,
    } else {
    }
    %c0 = arith.constant 0 : index
    %c0_1 = arith.constant 0 : index
    %3 = vector.load %arg2[%c0, %c0_1] : memref<16x128xf32, #tpu.memory_space<vmem>>, vector<16x128xf32>
    %c0_2 = arith.constant 0 : index
    %c0_3 = arith.constant 0 : index
    %4 = vector.load %arg3[%c0_2, %c0_3] : memref<128x128xf32, #tpu.memory_space<vmem>>, vector<128x128xf32>
    %cst = arith.constant dense<0.000000e+00> : vector<16x128xf32>
    %5 = tpu.matmul %3, %4, %cst {dimension_numbers = #tpu.dot_dimension_numbers<[1], [0], [0], [1], [0, 0, 1, 1], [], []>} : vector<16x128xf32>, vector<128x128xf32>, vector<16x128xf32> -> vector<16x128xf32>
    %c0_4 = arith.constant 0 : index
    %c0_5 = arith.constant 0 : index
    %6 = vector.load %arg4[%c0_4, %c0_5] : memref<1x128xf32, #tpu.memory_space<vmem>>, vector<1x128xf32>
    %7 = vector.broadcast %6 : vector<1x128xf32> to vector<16x128xf32>
    %8 = arith.addf %5, %7 : vector<16x128xf32>
    %cst_6 = arith.constant 5.000000e-01 : f32
    %9 = vector.broadcast %cst_6 : f32 to vector<16x128xf32>
    %10 = arith.mulf %8, %9 : vector<16x128xf32>
    %cst_7 = arith.constant 1.41421354 : f32
    %11 = vector.broadcast %cst_7 : f32 to vector<16x128xf32>
    %12 = arith.divf %8, %11 : vector<16x128xf32>
    %13 = math.erf %12 : vector<16x128xf32>
    %cst_8 = arith.constant 1.000000e+00 : f32
    %14 = vector.broadcast %cst_8 : f32 to vector<16x128xf32>
    %15 = arith.addf %14, %13 : vector<16x128xf32>
    %16 = arith.mulf %10, %15 : vector<16x128xf32>
    %c0_9 = arith.constant 0 : index
    %c0_10 = arith.constant 0 : index
    %17 = vector.load %arg8[%c0_9, %c0_10] : memref<16x128xf32, #tpu.memory_space<vmem>>, vector<16x128xf32>
    %c0_11 = arith.constant 0 : index
    %c0_12 = arith.constant 0 : index
    %18 = vector.load %arg5[%c0_11, %c0_12] : memref<128x128xf32, #tpu.memory_space<vmem>>, vector<128x128xf32>
    %cst_13 = arith.constant dense<0.000000e+00> : vector<16x128xf32>
    %19 = tpu.matmul %16, %18, %cst_13 {dimension_numbers = #tpu.dot_dimension_numbers<[1], [0], [0], [1], [0, 0, 1, 1], [], []>} : vector<16x128xf32>, vector<128x128xf32>, vector<16x128xf32> -> vector<16x128xf32>
    %20 = arith.addf %17, %19 : vector<16x128xf32>
    %c0_14 = arith.constant 0 : index
    %c0_15 = arith.constant 0 : index
    %21 = vector.load %arg8[%c0_14, %c0_15] : memref<16x128xf32, #tpu.memory_space<vmem>>, vector<16x128xf32>
    tpu.vector_store %arg8[%c0_14, %c0_15], %20 {strides = array<i32>} : memref<16x128xf32, #tpu.memory_space<vmem>>, vector<16x128xf32>,
    %c0_i32_16 = arith.constant 0 : i32
    %22 = arith.cmpi eq, %arg1, %c0_i32_16 : i32
    %23 = arith.extui %22 : i1 to i32
    %c0_i32_17 = arith.constant 0 : i32
    %24 = arith.cmpi ne, %23, %c0_i32_17 : i32
    scf.if %24 {
      %c0_18 = arith.constant 0 : index
      %c0_19 = arith.constant 0 : index
      %25 = vector.load %arg8[%c0_18, %c0_19] : memref<16x128xf32, #tpu.memory_space<vmem>>, vector<16x128xf32>
      %c0_20 = arith.constant 0 : index
      %c0_21 = arith.constant 0 : index
      %26 = vector.load %arg6[%c0_20, %c0_21] : memref<1x128xf32, #tpu.memory_space<vmem>>, vector<1x128xf32>
      %27 = vector.broadcast %26 : vector<1x128xf32> to vector<16x128xf32>
      %28 = arith.addf %25, %27 : vector<16x128xf32>
      %c0_22 = arith.constant 0 : index
      %c0_23 = arith.constant 0 : index
      %29 = vector.load %arg7[%c0_22, %c0_23] : memref<16x128xf32, #tpu.memory_space<vmem>>, vector<16x128xf32>
      tpu.vector_store %arg7[%c0_22, %c0_23], %28 {strides = array<i32>} : memref<16x128xf32, #tpu.memory_space<vmem>>, vector<16x128xf32>,
    } else {
    }
    return
  }
  func.func @transform_0(%arg0: i32, %arg1: i32) -> (i32, i32) {
    %c0_i32 = arith.constant 0 : i32
    %c0_i32_0 = arith.constant 0 : i32
    return %arg0, %c0_i32 : i32, i32
  }
  func.func @transform_1(%arg0: i32, %arg1: i32) -> (i32, i32) {
    %c0_i32 = arith.constant 0 : i32
    %c0_i32_0 = arith.constant 0 : i32
    return %c0_i32, %arg1 : i32, i32
  }
  func.func @transform_2(%arg0: i32, %arg1: i32) -> (i32, i32) {
    %c0_i32 = arith.constant 0 : i32
    %c0_i32_0 = arith.constant 0 : i32
    return %c0_i32, %arg1 : i32, i32
  }
  func.func @transform_3(%arg0: i32, %arg1: i32) -> (i32, i32) {
    %c0_i32 = arith.constant 0 : i32
    %c0_i32_0 = arith.constant 0 : i32
    return %arg1, %c0_i32 : i32, i32
  }
  func.func @transform_4(%arg0: i32, %arg1: i32) -> (i32, i32) {
    %c0_i32 = arith.constant 0 : i32
    %c0_i32_0 = arith.constant 0 : i32
    %c0_i32_1 = arith.constant 0 : i32
    return %c0_i32, %c0_i32_0 : i32, i32
  }
  func.func @transform_5(%arg0: i32, %arg1: i32) -> (i32, i32) {
    %c0_i32 = arith.constant 0 : i32
    %c0_i32_0 = arith.constant 0 : i32
    return %arg0, %c0_i32 : i32, i32
  }
}

</mosaic_0001>

<bundles_post_ra>
// kernel: tpu_custom_call.1
= control target key start
LH: loop header
LB: loop body
LE: loop exit
PB: predicated region body
PF: predicated region fallthrough
CT: control target
= control target key end

     0   :  { %10 = vsyncpa [#allocation4], 0  ;;  %s695_s0 = inlined_call_operand.hbm [shape: f32[16,128], index: 0, kind: input, shape index: {}]   ;;  %s696_s1 = inlined_call_operand.hbm [shape: f32[128,128], index: 1, kind: input, shape index: {}]   ;;  %s697_s2 = inlined_call_operand.vmem [shape: f32[1,128], index: 2, kind: input, shape index: {}]   ;;  %s698_s3 = inlined_call_operand.hbm [shape: f32[128,128], index: 3, kind: input, shape index: {}]   ;;  %s699_s4 = inlined_call_operand.vmem [shape: f32[1,128], index: 4, kind: input, shape index: {}]   ;;  %s700_s5 = inlined_call_operand.hbm [shape: f32[16,128], index: 5, kind: output, shape index: {}]  }
   0x1   :  { %11 = vsyncpa [#allocation7], 0 }
   0x2   :  { %12 = vsyncpa [#allocation5], 0  ;;  %s586_s18 = smov [#allocation6]   ;;  %s587_s20 = smov [#allocation3]  }
   0x3   :  { %s30_s19 = sshll.u32 %s586_s18, 4  ;;  %s18_s21 = sshll.u32 %s587_s20, 4  ;;  %s31_s19 = int_to_ptr.vmem [resolvable:$true] %s30_s19  ;;  %s622_s21 = int_to_ptr.vmem [resolvable:$true] %s18_s21 }
   0x4   :  { %s492_s24 = scalar_lea.hbm %s696_s1, 2048 }
   0x5   :  { %p493_p0 = scmp.ne.s32.totalorder %s696_s1, %s492_s24  ;;  %p496_p1 = scmp.lt.u32.totalorder %s492_s24, %s696_s1 }
   0x7   :  { %p498_p2 = pnand %p496_p1, %p493_p0 }
   0x9   :  { %501 = shalt.err (!%p498_p2)
}
   0xa   :  { %s502_s29 = scalar_lea.vmem %s31_s19, 2048  ;;  %p507_p4 = scmp.lt.s32.totalorder %s31_s19, %s31_s19 }
   0xb   :  { %p503_p3 = scmp.ne.s32.totalorder %s31_s19, %s502_s29  ;;  %p508_p5 = scmp.lt.s32.totalorder %s502_s29, %s502_s29 }
   0xd   :  { %p509_p6 = por %p508_p5, %p507_p4 }
   0xf   :  { %p510_p7 = pnand %p509_p6, %p503_p3 }
  0x11   :  { %513 = shalt.err (!%p510_p7)
}
  0x12   :  { %s588_s30 = smov 128   ;;  %s589_s6 = smov 8  }
  0x13   :  { %36 = dma.hbm_to_vmem [thread:$0]  %s696_s1, 2048, %s31_s19, [#allocation7], %s588_s30, %s588_s30, %s589_s6  }
  0x14   :  { %s514_s11 = scalar_lea.hbm %s695_s0, 256 }
  0x15   :  { %p515_p8 = scmp.ne.s32.totalorder %s695_s0, %s514_s11  ;;  %p518_p9 = scmp.lt.u32.totalorder %s514_s11, %s695_s0 }
  0x17   :  { %p520_p10 = pnand %p518_p9, %p515_p8 }
  0x19   :  { %523 = shalt.err (!%p520_p10)
}
  0x1a   :  { %s524_s16 = scalar_lea.vmem %s622_s21, 256  ;;  %p529_p12 = scmp.lt.s32.totalorder %s622_s21, %s622_s21 }
  0x1b   :  { %p525_p11 = scmp.ne.s32.totalorder %s622_s21, %s524_s16  ;;  %p530_p13 = scmp.lt.s32.totalorder %s524_s16, %s524_s16 }
  0x1d   :  { %p531_p0 = por %p530_p13, %p529_p12 }
  0x1f   :  { %p532_p1 = pnand %p531_p0, %p525_p11 }
  0x21   :  { %535 = shalt.err (!%p532_p1)
}
  0x22   :  { %24 = dma.hbm_to_vmem [thread:$0]  %s695_s0, 256, %s622_s21, [#allocation4], %s588_s30, %s588_s30, %s589_s6  }
  0x23   :  { %s590_s18 = smov [#allocation8]   ;;  %s536_s23 = scalar_lea.hbm %s698_s3, 2048 }
  0x24   :  { %s44_s19 = sshll.u32 %s590_s18, 4  ;;  %p537_p2 = scmp.ne.s32.totalorder %s698_s3, %s536_s23  ;;  %s45_s19 = int_to_ptr.vmem [resolvable:$true] %s44_s19 }
  0x25   :  { %p540_p3 = scmp.lt.u32.totalorder %s536_s23, %s698_s3 }
  0x27   :  { %p542_p4 = pnand %p540_p3, %p537_p2 }
  0x29   :  { %545 = shalt.err (!%p542_p4)
}
  0x2a   :  { %s546_s28 = scalar_lea.vmem %s45_s19, 2048  ;;  %p551_p6 = scmp.lt.s32.totalorder %s45_s19, %s45_s19 }
  0x2b   :  { %p547_p5 = scmp.ne.s32.totalorder %s45_s19, %s546_s28  ;;  %p552_p7 = scmp.lt.s32.totalorder %s546_s28, %s546_s28 }
  0x2d   :  { %p553_p8 = por %p552_p7, %p551_p6 }
  0x2f   :  { %p554_p9 = pnand %p553_p8, %p547_p5 }
  0x31   :  { %557 = shalt.err (!%p554_p9)
}
  0x32   :  { %50 = dma.hbm_to_vmem [thread:$0]  %s698_s3, 2048, %s45_s19, [#allocation7], %s588_s30, %s588_s30, %s589_s6  }
  0x33   :  { %580 = dma.done.wait [#allocation4], 256  }
  0x34   :  { %581 = vsyncadd [#allocation4], 4294967040 }
  0x35   :  { %582 = dma.done.wait [#allocation7], 4096  }
  0x36   :  { %583 = vsyncadd [#allocation7], 4294963200  ;;  %v70_v0 = vld [vmem:[#allocation6] sm:$0xff]  ;;  %v71_v1 = vld [vmem:[#allocation6 + $0x8] sm:$0xff]  ;;  %s591_s8 = smov [#allocation9]  }
  0x37   :  { %v72_v2 = vld [vmem:[#allocation6 + $0x10] sm:$0xff]  ;;  %v418_v3 = vpack.c.bf16 %v71_v1, %v70_v0  ;;  %v73_v4 = vld [vmem:[#allocation6 + $0x18] sm:$0xff]  ;;  %v74_v6 = vld [vmem:[#allocation6 + $0x20] sm:$0xff]  ;;  %s297_s9 = sshll.u32 %s591_s8, 4  ;;  %s298_s9 = int_to_ptr.vmem [resolvable:$true] %s297_s9 }
  0x38   :  { %v422_v5 = vpack.c.bf16 %v73_v4, %v72_v2  ;;  %v75_v7 = vld [vmem:[#allocation6 + $0x28] sm:$0xff]  ;;  %v76_v9 = vld [vmem:[#allocation6 + $0x30] sm:$0xff]  ;;  %v77_v10 = vld [vmem:[#allocation6 + $0x38] sm:$0xff]  ;;  %s558_s10 = scalar_lea.vmem %s298_s9, 256  ;;  %p563_p11 = scmp.lt.s32.totalorder %s298_s9, %s298_s9 }
  0x39   :  { %419 = vmatprep.subr.bf16.mxu0 %v418_v3  ;;  %v426_v8 = vpack.c.bf16 %v75_v7, %v74_v6  ;;  %v68_v11 = vld [vmem:[#allocation3] sm:$0xff]  ;;  %v181_v12 = vld [vmem:[#allocation8] sm:$0xff]  ;;  %v182_v13 = vld [vmem:[#allocation8 + $0x8] sm:$0xff]  ;;  %v430_v20 = vpack.c.bf16 %v77_v10, %v76_v9  ;;  %p559_p10 = scmp.ne.s32.totalorder %s298_s9, %s558_s10  ;;  %p564_p12 = scmp.lt.s32.totalorder %s558_s10, %s558_s10 }
  0x3a   :  { %421 = vmatpush3.bf16.msra.mxu0 %v418_v3  ;;  %380 = vmatprep.mubr.f32.mxu0 %v68_v11  ;;  %v183_v14 = vld [vmem:[#allocation8 + $0x10] sm:$0xff]  ;;  %v450_v15 = vpack.c.bf16 %v182_v13, %v181_v12  ;;  %v184_v16 = vld [vmem:[#allocation8 + $0x18] sm:$0xff]  ;;  %v185_v18 = vld [vmem:[#allocation8 + $0x20] sm:$0xff] }
  0x3b   :  { %423 = vmatprep.subr.bf16.mxu0 %v422_v5  ;;  %v454_v17 = vpack.c.bf16 %v184_v16, %v183_v14  ;;  %v186_v19 = vld [vmem:[#allocation8 + $0x28] sm:$0xff]  ;;  %v78_v21 = vld [vmem:[#allocation6 + $0x40] sm:$0xff]  ;;  %v80_v25 = vld [vmem:[#allocation6 + $0x50] sm:$0xff]  ;;  %p565_p13 = por %p564_p12, %p563_p11 }
  0x3c   :  { %451 = vmatprep.subr.bf16.mxu1 %v450_v15  ;;  %v79_v22 = vld [vmem:[#allocation6 + $0x48] sm:$0xff]  ;;  %v458_v23 = vpack.c.bf16 %v186_v19, %v185_v18  ;;  %v81_v26 = vld [vmem:[#allocation6 + $0x58] sm:$0xff]  ;;  %v82_v28 = vld [vmem:[#allocation6 + $0x60] sm:$0xff] }
  0x3d   :  { %453 = vmatpush3.bf16.msra.mxu1 %v450_v15  ;;  %v434_v24 = vpack.c.bf16 %v79_v22, %v78_v21  ;;  %v438_v27 = vpack.c.bf16 %v81_v26, %v80_v25  ;;  %v83_v29 = vld [vmem:[#allocation6 + $0x68] sm:$0xff]  ;;  %v84_v31 = vld [vmem:[#allocation6 + $0x70] sm:$0xff]  ;;  %v85_v32 = vld [vmem:[#allocation6 + $0x78] sm:$0xff]  ;;  %p566_p0 = pnand %p565_p13, %p559_p10 }
  0x3e   :  { %425 = vmatpush3.bf16.msra.mxu0 %v422_v5  ;;  %455 = vmatprep.subr.bf16.mxu1 %v454_v17  ;;  %v442_v30 = vpack.c.bf16 %v83_v29, %v82_v28  ;;  %v446_v33 = vpack.c.bf16 %v85_v32, %v84_v31  ;;  %v69_v34 = vld [vmem:[#allocation3 + $0x8] sm:$0xff]  ;;  %v187_v35 = vld [vmem:[#allocation8 + $0x30] sm:$0xff]  ;;  %v189_v38 = vld [vmem:[#allocation8 + $0x40] sm:$0xff] }
  0x3f   :  { %427 = vmatprep.subr.bf16.mxu0 %v426_v8  ;;  %v188_v36 = vld [vmem:[#allocation8 + $0x38] sm:$0xff]  ;;  %v190_v39 = vld [vmem:[#allocation8 + $0x48] sm:$0xff]  ;;  %v191_v41 = vld [vmem:[#allocation8 + $0x50] sm:$0xff] }
  0x40   :  { %v462_v37 = vpack.c.bf16 %v188_v36, %v187_v35  ;;  %v466_v40 = vpack.c.bf16 %v190_v39, %v189_v38  ;;  %v192_v42 = vld [vmem:[#allocation8 + $0x58] sm:$0xff]  ;;  %v193_v44 = vld [vmem:[#allocation8 + $0x60] sm:$0xff]  ;;  %v194_v45 = vld [vmem:[#allocation8 + $0x68] sm:$0xff] }
  0x41   :  { %457 = vmatpush3.bf16.msra.mxu1 %v454_v17  ;;  %v470_v43 = vpack.c.bf16 %v192_v42, %v191_v41  ;;  %v474_v46 = vpack.c.bf16 %v194_v45, %v193_v44  ;;  %v195_v47 = vld [vmem:[#allocation8 + $0x70] sm:$0xff]  ;;  %v196_v48 = vld [vmem:[#allocation8 + $0x78] sm:$0xff] }
  0x42   :  { %429 = vmatpush3.bf16.msra.mxu0 %v426_v8  ;;  %459 = vmatprep.subr.bf16.mxu1 %v458_v23  ;;  %v478_v49 = vpack.c.bf16 %v196_v48, %v195_v47  ;;  %v310_v50 = vld [vmem:[%s697_s2] ss:$0 sm:$0xff] }
  0x43   :  { %431 = vmatprep.subr.bf16.mxu0 %v430_v20  ;;  %v311_v1 = vld [vmem:[%s699_s4] ss:$0 sm:$0xff] }
  0x45   :  { %461 = vmatpush3.bf16.msra.mxu1 %v458_v23 }
  0x46   :  { %433 = vmatpush3.bf16.msra.mxu0 %v430_v20  ;;  %463 = vmatprep.subr.bf16.mxu1 %v462_v37 }
  0x47   :  { %435 = vmatprep.subr.bf16.mxu0 %v434_v24 }
  0x49   :  { %465 = vmatpush3.bf16.msra.mxu1 %v462_v37 }
  0x4a   :  { %437 = vmatpush3.bf16.msra.mxu0 %v434_v24  ;;  %467 = vmatprep.subr.bf16.mxu1 %v466_v40 }
  0x4b   :  { %439 = vmatprep.subr.bf16.mxu0 %v438_v27 }
  0x4d   :  { %469 = vmatpush3.bf16.msra.mxu1 %v466_v40 }
  0x4e   :  { %441 = vmatpush3.bf16.msra.mxu0 %v438_v27  ;;  %471 = vmatprep.subr.bf16.mxu1 %v470_v43 }
  0x4f   :  { %443 = vmatprep.subr.bf16.mxu0 %v442_v30 }
  0x51   :  { %473 = vmatpush3.bf16.msra.mxu1 %v470_v43 }
  0x52   :  { %445 = vmatpush3.bf16.msra.mxu0 %v442_v30  ;;  %475 = vmatprep.subr.bf16.mxu1 %v474_v46 }
  0x53   :  { %447 = vmatprep.subr.bf16.mxu0 %v446_v33 }
  0x55   :  { %477 = vmatpush3.bf16.msra.mxu1 %v474_v46 }
  0x56   :  { %449 = vmatpush3.bf16.msra.mxu0 %v446_v33  ;;  %479 = vmatprep.subr.bf16.mxu1 %v478_v49 }
  0x59   :  { %381 = vmatmul.mubr.f32.vlgmr.msra.gmra.mrb[0].mxu0 %v69_v34  ;;  %481 = vmatpush3.bf16.msra.mxu1 %v478_v49 }
 0x12c   :  { %v382_v51 = vpop.f32.mrb[0].mxu0 }
 0x12d   :  { %v165_v52 = vadd.f32 %v382_v51, %v310_v50  ;;  %v159_v53 = vpop.f32.mrb[1].mxu0 }
 0x12e   :  { %v160_v54 = vadd.f32 %v310_v50, %v159_v53 }
 0x12f   :  { %v172_v55 = vmul.f32 0.70710677, %v165_v52  ;;  %v169_v62 = vmul.f32 0.5, %v165_v52 }
 0x130   :  { %v171_v56 = vmul.f32 0.70710677, %v160_v54  ;;  %v168_v60 = vmul.f32 0.5, %v160_v54 }
 0x131   :  { %488 = verf.f32 %v172_v55 }
 0x132   :  { %490 = verf.f32 %v171_v56 }
 0x13b   :  { %v489_v57 = vpop.eup %488 }
 0x13c   :  { %v491_v58 = vpop.eup %490  ;;  %v176_v59 = vadd.f32 1.0, %v489_v57 }
 0x13d   :  { %v175_v61 = vadd.f32 1.0, %v491_v58 }
 0x13e   :  { %v178_v0 = vmul.f32 %v176_v59, %v169_v62 }
 0x13f   :  { %v177_v63 = vmul.f32 %v175_v61, %v168_v60 }
 0x141   :  { %415 = vmatprep.mubr.f32.mxu1 %v177_v63 }
 0x142   :  { %416 = vmatmul.mubr.f32.vlgmr.msra.gmra.mrb[0].mxu1 %v178_v0 }
 0x215   :  { %v417_v2 = vpop.f32.mrb[0].mxu1 }
 0x216   :  { %v289_v3 = vadd.f32 %v417_v2, %v311_v1  ;;  %v263_v4 = vpop.f32.mrb[1].mxu1 }
 0x217   :  { %v288_v5 = vadd.f32 %v311_v1, %v263_v4 }
 0x218   :  { %291 = vst [vmem:[#allocation9 + $0x8] sm:$0xff] %v289_v3 }
 0x219   :  { %290 = vst [vmem:[#allocation9] sm:$0xff] %v288_v5 }
 0x21a   :  { %569 = shalt.err (!%p566_p0)
}
 0x21b   :  { %s570_s4 = scalar_lea.hbm %s700_s5, 256 }
 0x21c   :  { %p571_p1 = scmp.ne.s32.totalorder %s700_s5, %s570_s4  ;;  %p574_p2 = scmp.lt.u32.totalorder %s570_s4, %s700_s5 }
 0x21e   :  { %p576_p3 = pnand %p574_p2, %p571_p1 }
 0x220   :  { %579 = shalt.err (!%p576_p3)
}
 0x221   :  { %303 = dma.vmem_to_hbm [thread:$0]  %s298_s9, 256, %s700_s5, [#allocation5], %s588_s30, %s588_s30, %s589_s6  }
 0x222   :  { %584 = dma.done.wait [#allocation5], 256  }
 0x223   :  { %585 = vsyncadd [#allocation5], 4294967040 }
 0x224   :  { %307 = vsyncpa [#allocation4], 1 }
 0x225   :  { %308 = vsyncpa [#allocation7], 1 }
 0x226   :  { %309 = vsyncpa [#allocation5], 1 }

// kernel: tpu_custom_call.1
= control target key start
LH: loop header
LB: loop body
LE: loop exit
PB: predicated region body
PF: predicated region fallthrough
CT: control target
= control target key end

     0   :  { %10 = vsyncpa [#allocation4], 0  ;;  %s695_s0 = inlined_call_operand.hbm [shape: f32[16,128], index: 0, kind: input, shape index: {}]   ;;  %s696_s1 = inlined_call_operand.hbm [shape: f32[128,128], index: 1, kind: input, shape index: {}]   ;;  %s697_s2 = inlined_call_operand.vmem [shape: f32[1,128], index: 2, kind: input, shape index: {}]   ;;  %s698_s3 = inlined_call_operand.hbm [shape: f32[128,128], index: 3, kind: input, shape index: {}]   ;;  %s699_s4 = inlined_call_operand.vmem [shape: f32[1,128], index: 4, kind: input, shape index: {}]   ;;  %s700_s5 = inlined_call_operand.hbm [shape: f32[16,128], index: 5, kind: output, shape index: {}]  }
   0x1   :  { %11 = vsyncpa [#allocation7], 0 }
   0x2   :  { %12 = vsyncpa [#allocation5], 0  ;;  %s586_s18 = smov [#allocation6]   ;;  %s587_s20 = smov [#allocation3]  }
   0x3   :  { %s30_s19 = sshll.u32 %s586_s18, 4  ;;  %s18_s21 = sshll.u32 %s587_s20, 4  ;;  %s31_s19 = int_to_ptr.vmem [resolvable:$true] %s30_s19  ;;  %s622_s21 = int_to_ptr.vmem [resolvable:$true] %s18_s21 }
   0x4   :  { %s492_s24 = scalar_lea.hbm %s696_s1, 2048 }
   0x5   :  { %p493_p0 = scmp.ne.s32.totalorder %s696_s1, %s492_s24  ;;  %p496_p1 = scmp.lt.u32.totalorder %s492_s24, %s696_s1 }
   0x7   :  { %p498_p2 = pnand %p496_p1, %p493_p0 }
   0x9   :  { %501 = shalt.err (!%p498_p2)
}
   0xa   :  { %s502_s29 = scalar_lea.vmem %s31_s19, 2048  ;;  %p507_p4 = scmp.lt.s32.totalorder %s31_s19, %s31_s19 }
   0xb   :  { %p503_p3 = scmp.ne.s32.totalorder %s31_s19, %s502_s29  ;;  %p508_p5 = scmp.lt.s32.totalorder %s502_s29, %s502_s29 }
   0xd   :  { %p509_p6 = por %p508_p5, %p507_p4 }
   0xf   :  { %p510_p7 = pnand %p509_p6, %p503_p3 }
  0x11   :  { %513 = shalt.err (!%p510_p7)
}
  0x12   :  { %s588_s30 = smov 128   ;;  %s589_s6 = smov 8  }
  0x13   :  { %36 = dma.hbm_to_vmem [thread:$0]  %s696_s1, 2048, %s31_s19, [#allocation7], %s588_s30, %s588_s30, %s589_s6  }
  0x14   :  { %s514_s11 = scalar_lea.hbm %s695_s0, 256 }
  0x15   :  { %p515_p8 = scmp.ne.s32.totalorder %s695_s0, %s514_s11  ;;  %p518_p9 = scmp.lt.u32.totalorder %s514_s11, %s695_s0 }
  0x17   :  { %p520_p10 = pnand %p518_p9, %p515_p8 }
  0x19   :  { %523 = shalt.err (!%p520_p10)
}
  0x1a   :  { %s524_s16 = scalar_lea.vmem %s622_s21, 256  ;;  %p529_p12 = scmp.lt.s32.totalorder %s622_s21, %s622_s21 }
  0x1b   :  { %p525_p11 = scmp.ne.s32.totalorder %s622_s21, %s524_s16  ;;  %p530_p13 = scmp.lt.s32.totalorder %s524_s16, %s524_s16 }
  0x1d   :  { %p531_p0 = por %p530_p13, %p529_p12 }
  0x1f   :  { %p532_p1 = pnand %p531_p0, %p525_p11 }
  0x21   :  { %535 = shalt.err (!%p532_p1)
}
  0x22   :  { %24 = dma.hbm_to_vmem [thread:$0]  %s695_s0, 256, %s622_s21, [#allocation4], %s588_s30, %s588_s30, %s589_s6  }
  0x23   :  { %s590_s18 = smov [#allocation8]   ;;  %s536_s23 = scalar_lea.hbm %s698_s3, 2048 }
  0x24   :  { %s44_s19 = sshll.u32 %s590_s18, 4  ;;  %p537_p2 = scmp.ne.s32.totalorder %s698_s3, %s536_s23  ;;  %s45_s19 = int_to_ptr.vmem [resolvable:$true] %s44_s19 }
  0x25   :  { %p540_p3 = scmp.lt.u32.totalorder %s536_s23, %s698_s3 }
  0x27   :  { %p542_p4 = pnand %p540_p3, %p537_p2 }
  0x29   :  { %545 = shalt.err (!%p542_p4)
}
  0x2a   :  { %s546_s28 = scalar_lea.vmem %s45_s19, 2048  ;;  %p551_p6 = scmp.lt.s32.totalorder %s45_s19, %s45_s19 }
  0x2b   :  { %p547_p5 = scmp.ne.s32.totalorder %s45_s19, %s546_s28  ;;  %p552_p7 = scmp.lt.s32.totalorder %s546_s28, %s546_s28 }
  0x2d   :  { %p553_p8 = por %p552_p7, %p551_p6 }
  0x2f   :  { %p554_p9 = pnand %p553_p8, %p547_p5 }
  0x31   :  { %557 = shalt.err (!%p554_p9)
}
  0x32   :  { %50 = dma.hbm_to_vmem [thread:$0]  %s698_s3, 2048, %s45_s19, [#allocation7], %s588_s30, %s588_s30, %s589_s6  }
  0x33   :  { %580 = dma.done.wait [#allocation4], 256  }
  0x34   :  { %581 = vsyncadd [#allocation4], 4294967040 }
  0x35   :  { %582 = dma.done.wait [#allocation7], 4096  }
  0x36   :  { %583 = vsyncadd [#allocation7], 4294963200  ;;  %v70_v0 = vld [vmem:[#allocation6] sm:$0xff]  ;;  %v71_v1 = vld [vmem:[#allocation6 + $0x8] sm:$0xff]  ;;  %s591_s8 = smov [#allocation9]  }
  0x37   :  { %v72_v2 = vld [vmem:[#allocation6 + $0x10] sm:$0xff]  ;;  %v418_v3 = vpack.c.bf16 %v71_v1, %v70_v0  ;;  %v73_v4 = vld [vmem:[#allocation6 + $0x18] sm:$0xff]  ;;  %v74_v6 = vld [vmem:[#allocation6 + $0x20] sm:$0xff]  ;;  %s297_s9 = sshll.u32 %s591_s8, 4  ;;  %s298_s9 = int_to_ptr.vmem [resolvable:$true] %s297_s9 }
  0x38   :  { %v422_v5 = vpack.c.bf16 %v73_v4, %v72_v2  ;;  %v75_v7 = vld [vmem:[#allocation6 + $0x28] sm:$0xff]  ;;  %v76_v9 = vld [vmem:[#allocation6 + $0x30] sm:$0xff]  ;;  %v77_v10 = vld [vmem:[#allocation6 + $0x38] sm:$0xff]  ;;  %s558_s10 = scalar_lea.vmem %s298_s9, 256  ;;  %p563_p11 = scmp.lt.s32.totalorder %s298_s9, %s298_s9 }
  0x39   :  { %419 = vmatprep.subr.bf16.mxu0 %v418_v3  ;;  %v426_v8 = vpack.c.bf16 %v75_v7, %v74_v6  ;;  %v68_v11 = vld [vmem:[#allocation3] sm:$0xff]  ;;  %v181_v12 = vld [vmem:[#allocation8] sm:$0xff]  ;;  %v182_v13 = vld [vmem:[#allocation8 + $0x8] sm:$0xff]  ;;  %v430_v20 = vpack.c.bf16 %v77_v10, %v76_v9  ;;  %p559_p10 = scmp.ne.s32.totalorder %s298_s9, %s558_s10  ;;  %p564_p12 = scmp.lt.s32.totalorder %s558_s10, %s558_s10 }
  0x3a   :  { %421 = vmatpush3.bf16.msra.mxu0 %v418_v3  ;;  %380 = vmatprep.mubr.f32.mxu0 %v68_v11  ;;  %v183_v14 = vld [vmem:[#allocation8 + $0x10] sm:$0xff]  ;;  %v450_v15 = vpack.c.bf16 %v182_v13, %v181_v12  ;;  %v184_v16 = vld [vmem:[#allocation8 + $0x18] sm:$0xff]  ;;  %v185_v18 = vld [vmem:[#allocation8 + $0x20] sm:$0xff] }
  0x3b   :  { %423 = vmatprep.subr.bf16.mxu0 %v422_v5  ;;  %v454_v17 = vpack.c.bf16 %v184_v16, %v183_v14  ;;  %v186_v19 = vld [vmem:[#allocation8 + $0x28] sm:$0xff]  ;;  %v78_v21 = vld [vmem:[#allocation6 + $0x40] sm:$0xff]  ;;  %v80_v25 = vld [vmem:[#allocation6 + $0x50] sm:$0xff]  ;;  %p565_p13 = por %p564_p12, %p563_p11 }
  0x3c   :  { %451 = vmatprep.subr.bf16.mxu1 %v450_v15  ;;  %v79_v22 = vld [vmem:[#allocation6 + $0x48] sm:$0xff]  ;;  %v458_v23 = vpack.c.bf16 %v186_v19, %v185_v18  ;;  %v81_v26 = vld [vmem:[#allocation6 + $0x58] sm:$0xff]  ;;  %v82_v28 = vld [vmem:[#allocation6 + $0x60] sm:$0xff] }
  0x3d   :  { %453 = vmatpush3.bf16.msra.mxu1 %v450_v15  ;;  %v434_v24 = vpack.c.bf16 %v79_v22, %v78_v21  ;;  %v438_v27 = vpack.c.bf16 %v81_v26, %v80_v25  ;;  %v83_v29 = vld [vmem:[#allocation6 + $0x68] sm:$0xff]  ;;  %v84_v31 = vld [vmem:[#allocation6 + $0x70] sm:$0xff]  ;;  %v85_v32 = vld [vmem:[#allocation6 + $0x78] sm:$0xff]  ;;  %p566_p0 = pnand %p565_p13, %p559_p10 }
  0x3e   :  { %425 = vmatpush3.bf16.msra.mxu0 %v422_v5  ;;  %455 = vmatprep.subr.bf16.mxu1 %v454_v17  ;;  %v442_v30 = vpack.c.bf16 %v83_v29, %v82_v28  ;;  %v446_v33 = vpack.c.bf16 %v85_v32, %v84_v31  ;;  %v69_v34 = vld [vmem:[#allocation3 + $0x8] sm:$0xff]  ;;  %v187_v35 = vld [vmem:[#allocation8 + $0x30] sm:$0xff]  ;;  %v189_v38 = vld [vmem:[#allocation8 + $0x40] sm:$0xff] }
  0x3f   :  { %427 = vmatprep.subr.bf16.mxu0 %v426_v8  ;;  %v188_v36 = vld [vmem:[#allocation8 + $0x38] sm:$0xff]  ;;  %v190_v39 = vld [vmem:[#allocation8 + $0x48] sm:$0xff]  ;;  %v191_v41 = vld [vmem:[#allocation8 + $0x50] sm:$0xff] }
  0x40   :  { %v462_v37 = vpack.c.bf16 %v188_v36, %v187_v35  ;;  %v466_v40 = vpack.c.bf16 %v190_v39, %v189_v38  ;;  %v192_v42 = vld [vmem:[#allocation8 + $0x58] sm:$0xff]  ;;  %v193_v44 = vld [vmem:[#allocation8 + $0x60] sm:$0xff]  ;;  %v194_v45 = vld [vmem:[#allocation8 + $0x68] sm:$0xff] }
  0x41   :  { %457 = vmatpush3.bf16.msra.mxu1 %v454_v17  ;;  %v470_v43 = vpack.c.bf16 %v192_v42, %v191_v41  ;;  %v474_v46 = vpack.c.bf16 %v194_v45, %v193_v44  ;;  %v195_v47 = vld [vmem:[#allocation8 + $0x70] sm:$0xff]  ;;  %v196_v48 = vld [vmem:[#allocation8 + $0x78] sm:$0xff] }
  0x42   :  { %429 = vmatpush3.bf16.msra.mxu0 %v426_v8  ;;  %459 = vmatprep.subr.bf16.mxu1 %v458_v23  ;;  %v478_v49 = vpack.c.bf16 %v196_v48, %v195_v47  ;;  %v310_v50 = vld [vmem:[%s697_s2] ss:$0 sm:$0xff] }
  0x43   :  { %431 = vmatprep.subr.bf16.mxu0 %v430_v20  ;;  %v311_v1 = vld [vmem:[%s699_s4] ss:$0 sm:$0xff] }
  0x45   :  { %461 = vmatpush3.bf16.msra.mxu1 %v458_v23 }
  0x46   :  { %433 = vmatpush3.bf16.msra.mxu0 %v430_v20  ;;  %463 = vmatprep.subr.bf16.mxu1 %v462_v37 }
  0x47   :  { %435 = vmatprep.subr.bf16.mxu0 %v434_v24 }
  0x49   :  { %465 = vmatpush3.bf16.msra.mxu1 %v462_v37 }
  0x4a   :  { %437 = vmatpush3.bf16.msra.mxu0 %v434_v24  ;;  %467 = vmatprep.subr.bf16.mxu1 %v466_v40 }
  0x4b   :  { %439 = vmatprep.subr.bf16.mxu0 %v438_v27 }
  0x4d   :  { %469 = vmatpush3.bf16.msra.mxu1 %v466_v40 }
  0x4e   :  { %441 = vmatpush3.bf16.msra.mxu0 %v438_v27  ;;  %471 = vmatprep.subr.bf16.mxu1 %v470_v43 }
  0x4f   :  { %443 = vmatprep.subr.bf16.mxu0 %v442_v30 }
  0x51   :  { %473 = vmatpush3.bf16.msra.mxu1 %v470_v43 }
  0x52   :  { %445 = vmatpush3.bf16.msra.mxu0 %v442_v30  ;;  %475 = vmatprep.subr.bf16.mxu1 %v474_v46 }
  0x53   :  { %447 = vmatprep.subr.bf16.mxu0 %v446_v33 }
  0x55   :  { %477 = vmatpush3.bf16.msra.mxu1 %v474_v46 }
  0x56   :  { %449 = vmatpush3.bf16.msra.mxu0 %v446_v33  ;;  %479 = vmatprep.subr.bf16.mxu1 %v478_v49 }
  0x59   :  { %381 = vmatmul.mubr.f32.vlgmr.msra.gmra.mrb[0].mxu0 %v69_v34  ;;  %481 = vmatpush3.bf16.msra.mxu1 %v478_v49 }
 0x12c   :  { %v382_v51 = vpop.f32.mrb[0].mxu0 }
 0x12d   :  { %v165_v52 = vadd.f32 %v382_v51, %v310_v50  ;;  %v159_v53 = vpop.f32.mrb[1].mxu0 }
 0x12e   :  { %v160_v54 = vadd.f32 %v310_v50, %v159_v53 }
 0x12f   :  { %v172_v55 = vmul.f32 0.70710677, %v165_v52  ;;  %v169_v62 = vmul.f32 0.5, %v165_v52 }
 0x130   :  { %v171_v56 = vmul.f32 0.70710677, %v160_v54  ;;  %v168_v60 = vmul.f32 0.5, %v160_v54 }
 0x131   :  { %488 = verf.f32 %v172_v55 }
 0x132   :  { %490 = verf.f32 %v171_v56 }
 0x13b   :  { %v489_v57 = vpop.eup %488 }
 0x13c   :  { %v491_v58 = vpop.eup %490  ;;  %v176_v59 = vadd.f32 1.0, %v489_v57 }
 0x13d   :  { %v175_v61 = vadd.f32 1.0, %v491_v58 }
 0x13e   :  { %v178_v0 = vmul.f32 %v176_v59, %v169_v62 }
 0x13f   :  { %v177_v63 = vmul.f32 %v175_v61, %v168_v60 }
 0x141   :  { %415 = vmatprep.mubr.f32.mxu1 %v177_v63 }
 0x142   :  { %416 = vmatmul.mubr.f32.vlgmr.msra.gmra.mrb[0].mxu1 %v178_v0 }
 0x215   :  { %v417_v2 = vpop.f32.mrb[0].mxu1 }
 0x216   :  { %v289_v3 = vadd.f32 %v417_v2, %v311_v1  ;;  %v263_v4 = vpop.f32.mrb[1].mxu1 }
 0x217   :  { %v288_v5 = vadd.f32 %v311_v1, %v263_v4 }
 0x218   :  { %291 = vst [vmem:[#allocation9 + $0x8] sm:$0xff] %v289_v3 }
 0x219   :  { %290 = vst [vmem:[#allocation9] sm:$0xff] %v288_v5 }
 0x21a   :  { %569 = shalt.err (!%p566_p0)
}
 0x21b   :  { %s570_s4 = scalar_lea.hbm %s700_s5, 256 }
 0x21c   :  { %p571_p1 = scmp.ne.s32.totalorder %s700_s5, %s570_s4  ;;  %p574_p2 = scmp.lt.u32.totalorder %s570_s4, %s700_s5 }
 0x21e   :  { %p576_p3 = pnand %p574_p2, %p571_p1 }
 0x220   :  { %579 = shalt.err (!%p576_p3)
}
 0x221   :  { %303 = dma.vmem_to_hbm [thread:$0]  %s298_s9, 256, %s700_s5, [#allocation5], %s588_s30, %s588_s30, %s589_s6  }
 0x222   :  { %584 = dma.done.wait [#allocation5], 256  }
 0x223   :  { %585 = vsyncadd [#allocation5], 4294967040 }
 0x224   :  { %307 = vsyncpa [#allocation4], 1 }
 0x225   :  { %308 = vsyncpa [#allocation7], 1 }
 0x226   :  { %309 = vsyncpa [#allocation5], 1 }

</bundles_post_ra>
